<compile_context>
chip_gen: v6e
topology: v6e:2x2x1
jax: 0.10.0
libtpu: 0.0.40
codegen_flags: <defaults>
</compile_context>

<pallas_src>
import jax
import jax.numpy as jnp
from jax.experimental import pallas as pl
from jax.experimental.pallas import tpu as pltpu


def _detect_tpu_generation():
    """Return (min_grid_steps, target_tile_bytes) tuned per TPU generation.

    v7x-like chips (<=64 MiB VMEM per TensorCore, 2 TCs) want >=2 pipelined
    steps per core and bigger tiles; v5e/v6e (1 TC, 128 MiB VMEM) get no forced
    split and ~2 MiB tiles (safe under v5e's 16 MiB scoped-VMEM default)."""
    try:
        vmem = int(pltpu.get_tpu_info().vmem_capacity_bytes)
        if vmem <= (64 << 20):
            return 4, (4 << 20)
    except Exception:
        pass
    return 1, (2 << 20)


_MIN_GRID_STEPS, _TARGET_TILE_BYTES = _detect_tpu_generation()


def _masksembles2d_kernel(msum_ref, x_ref, o_ref):
    # msum_ref: (1, L) f32, constant block index -> stays resident in VMEM.
    # x_ref:    (TB, L) native dtype row tile.
    # o_ref:    (TB, L) f32 row tile (lane-dense stores).
    o_ref[...] = x_ref[...].astype(jnp.float32) * msum_ref[...]


def _row_tile(num_rows, lane_width, *, min_steps, elem_bytes=4,
              target_bytes=2 << 20):
    """Rows per block: <= target_bytes per buffer, multiple of 8 sublanes (or the
    full row count when it is < 8), and >= min_steps grid steps when the row
    count allows it (so v7x's two TensorCores each run >=2 pipelined steps)."""
    if num_rows <= 8:
        return num_rows
    tb = max(8, (target_bytes // (lane_width * elem_bytes)) // 8 * 8)
    if min_steps > 1:
        per_step = (num_rows // min_steps) // 8 * 8
        tb = min(tb, per_step) if per_step >= 8 else 8
    tb = min(tb, (num_rows // 8) * 8)
    return max(tb, 8)


def masksembles2d(x, masks):
    """x: (N, C, H, W); masks: (n, channels) with channels == H. Returns float32."""
    N, C, H, W = x.shape
    n, ch = masks.shape
    assert H == ch, "Masksembles2D (as written) requires input H == channels"

    # Hoisted mask reduction: sum over the n masks, expand along W.
    msum = jnp.sum(masks.astype(jnp.float32), axis=0)    # (H,)
    msum_w = jnp.repeat(msum, W)                          # (H*W,)

    if H * W >= 128:
        # Already lane-dense: rows = N*C, lanes = H*W.
        R, L = N * C, H * W
        msum_row = msum_w.reshape(1, L)
    else:
        # Small feature maps: fold C into the lane axis so stores are full-width.
        R, L = N, C * H * W
        msum_row = jnp.tile(msum_w, C).reshape(1, L)
    x2 = x.reshape(R, L)          # contiguous reshape -> free view, no HBM pass

    tb = _row_tile(R, L, min_steps=_MIN_GRID_STEPS,
                   target_bytes=_TARGET_TILE_BYTES)
    in_bytes = x.dtype.itemsize
    cost = pl.CostEstimate(flops=R * L, transcendentals=0,
                           bytes_accessed=R * L * (in_bytes + 4) + L * 4)

    out = pl.pallas_call(
        _masksembles2d_kernel,
        out_shape=jax.ShapeDtypeStruct((R, L), jnp.float32),
        grid_spec=pltpu.PrefetchScalarGridSpec(
            num_scalar_prefetch=0,
            grid=(pl.cdiv(R, tb),),                     # ragged last block OK
            in_specs=[
                pl.BlockSpec((1, L), lambda i: (0, 0)),  # resident mask row
                pl.BlockSpec((tb, L), lambda i: (i, 0)),
            ],
            out_specs=pl.BlockSpec((tb, L), lambda i: (i, 0)),
        ),
        compiler_params=pltpu.CompilerParams(
            dimension_semantics=("parallel",)),
        cost_estimate=cost,
    )(msum_row, x2)

    return out.reshape(N, C, H, W)


def make_masks(channels, n, scale):
    # Deterministic stand-in for masksembles.common.generation_wrapper:
    # binary (n, channels) masks with ~channels/scale ones per row (shifted windows).
    # TODO(synk): the library's stochastic binary-search mask generation is replaced
    # by this deterministic construction (same shape / dtype semantics).
    k = max(1, int(round(channels / scale)))
    c = jnp.arange(channels)
    rows = []
    for i in range(n):
        start = (i * channels) // n
        rows.append((((c - start) % channels) < k).astype(jnp.float32))
    return jnp.stack(rows, axis=0)  # (n, channels)


def _reference(x, masks):
    # Pure-JAX reference of the torch forward (mask applied along H, summed over n).
    msum = jnp.sum(masks.astype(jnp.float32), axis=0)
    return (x.astype(jnp.float32) * msum[None, None, :, None]).astype(jnp.float32)


if __name__ == "__main__":
    fwd = jax.jit(masksembles2d)
    key = jax.random.PRNGKey(0)
    k1, k2 = jax.random.split(key)

    # Config 1: H*W >= 128  -> (N*C, H*W) layout.
    channels, n, scale = 16, 4, 2.0
    batch, H, W = 4, channels, 16            # forward requires H == channels
    x1 = jax.random.normal(k1, (batch, channels, H, W), dtype=jnp.float32)
    m1 = make_masks(channels, n, scale)
    out1 = jax.block_until_ready(fwd(x1, m1))
    assert out1.shape == x1.shape and out1.dtype == jnp.float32
    assert jnp.array_equal(out1, _reference(x1, m1))

    # Config 2: H*W < 128   -> C folded into the lane axis (lane-dense stores).
    channels2, n2 = 8, 4
    batch2, H2, W2 = 4, channels2, 8
    x2 = jax.random.normal(k2, (batch2, channels2, H2, W2), dtype=jnp.float32)
    m2 = make_masks(channels2, n2, 2.0)
    out2 = jax.block_until_ready(fwd(x2, m2))
    assert out2.shape == x2.shape and out2.dtype == jnp.float32
    assert jnp.array_equal(out2, _reference(x2, m2))

    print("KERNEL_OK")
</pallas_src>

<mosaic_0001>
module attributes {stable_mosaic.version = 11 : i64} {
  func.func @_masksembles2d_kernel(%arg0: i32, %arg1: memref<1x256xf32, #tpu.memory_space<vmem>>, %arg2: memref<64x256xf32, #tpu.memory_space<vmem>>, %arg3: memref<64x256xf32, #tpu.memory_space<vmem>>) attributes {dimension_semantics = [#tpu.dimension_semantics<parallel>], iteration_bounds = array<i64: 1>, scalar_prefetch = 0 : i64, scratch_operands = 0 : i64, tpu.core_type = #tpu.core_type<tc>, window_params = [{pipeline_mode = #tpu.pipeline_mode<synchronous>, transform_indices = @transform_0, window_bounds = array<i64: 1, 256>}, {transform_indices = @transform_1, window_bounds = array<i64: 64, 256>}, {transform_indices = @transform_2, window_bounds = array<i64: 64, 256>}]} {
    %c0 = arith.constant 0 : index
    %c0_0 = arith.constant 0 : index
    %0 = vector.load %arg2[%c0, %c0_0] : memref<64x256xf32, #tpu.memory_space<vmem>>, vector<64x256xf32>
    %c0_1 = arith.constant 0 : index
    %c0_2 = arith.constant 0 : index
    %1 = vector.load %arg1[%c0_1, %c0_2] : memref<1x256xf32, #tpu.memory_space<vmem>>, vector<1x256xf32>
    %2 = vector.broadcast %1 : vector<1x256xf32> to vector<64x256xf32>
    %3 = arith.mulf %0, %2 : vector<64x256xf32>
    %c0_3 = arith.constant 0 : index
    %c0_4 = arith.constant 0 : index
    %4 = vector.load %arg3[%c0_3, %c0_4] : memref<64x256xf32, #tpu.memory_space<vmem>>, vector<64x256xf32>
    tpu.vector_store %arg3[%c0_3, %c0_4], %3 {strides = array<i32>} : memref<64x256xf32, #tpu.memory_space<vmem>>, vector<64x256xf32>,
    return
  }
  func.func @transform_0(%arg0: i32) -> (i32, i32) {
    %c0_i32 = arith.constant 0 : i32
    %c0_i32_0 = arith.constant 0 : i32
    %c0_i32_1 = arith.constant 0 : i32
    return %c0_i32, %c0_i32_0 : i32, i32
  }
  func.func @transform_1(%arg0: i32) -> (i32, i32) {
    %c0_i32 = arith.constant 0 : i32
    %c0_i32_0 = arith.constant 0 : i32
    return %arg0, %c0_i32 : i32, i32
  }
  func.func @transform_2(%arg0: i32) -> (i32, i32) {
    %c0_i32 = arith.constant 0 : i32
    %c0_i32_0 = arith.constant 0 : i32
    return %arg0, %c0_i32 : i32, i32
  }
}

</mosaic_0001>

<bundles_post_ra>
// kernel: masksembles2d.1
= control target key start
LH: loop header
LB: loop body
LE: loop exit
PB: predicated region body
PF: predicated region fallthrough
CT: control target
= control target key end

     0   :  { %v29_v0 = vlaneseq  ;;  %s189_s0 = inlined_call_operand.vmem [shape: f32[1,256], index: 0, kind: input, shape index: {}]   ;;  %s190_s1 = inlined_call_operand.vmem [shape: f32[64,256], index: 1, kind: input, shape index: {}]   ;;  %s191_s2 = inlined_call_operand.vmem [shape: f32[64,256], index: 2, kind: output, shape index: {}]  }
   0x1   :  { %v11_v2 = vld [vmem:[%s190_s1] sm:$0xff]  ;;  %v12_v5 = vld [vmem:[%s190_s1 + $0x8] sm:$0xff]  ;;  %v13_v7 = vld [vmem:[%s190_s1 + $0x10] sm:$0xff] }
   0x2   :  { %v30_v1 = vshrl.u32 %v29_v0, 7  ;;  %v27_v3 = vld [vmem:[%s189_s0] sm:$0x3]  ;;  %v14_v8 = vld [vmem:[%s190_s1 + $0x18] sm:$0xff]  ;;  %v16_v10 = vld [vmem:[%s190_s1 + $0x28] sm:$0xff] }
   0x3   :  { %v15_v9 = vld [vmem:[%s190_s1 + $0x20] sm:$0xff]  ;;  %v17_v11 = vld [vmem:[%s190_s1 + $0x30] sm:$0xff]  ;;  %v18_v14 = vld [vmem:[%s190_s1 + $0x38] sm:$0xff] }
   0x4   :  { %v31_v4 = vsub.s32 0, %v30_v1  ;;  %v35_v6 = vsub.s32 1, %v30_v1  ;;  %v19_v15 = vld [vmem:[%s190_s1 + $0x40] sm:$0xff]  ;;  %v20_v16 = vld [vmem:[%s190_s1 + $0x48] sm:$0xff]  ;;  %v21_v17 = vld [vmem:[%s190_s1 + $0x50] sm:$0xff] }
   0x5   :  { %v22_v18 = vld [vmem:[%s190_s1 + $0x58] sm:$0xff]  ;;  %v23_v19 = vld [vmem:[%s190_s1 + $0x60] sm:$0xff]  ;;  %v24_v24 = vld [vmem:[%s190_s1 + $0x68] sm:$0xff] }
   0x6   :  { %v32_v12 = vrot.slane %v27_v3, %v31_v4  ;;  %v36_v13 = vrot.slane %v27_v3, %v35_v6  ;;  %v25_v25 = vld [vmem:[%s190_s1 + $0x70] sm:$0xff]  ;;  %v26_v26 = vld [vmem:[%s190_s1 + $0x78] sm:$0xff] }
   0x8   :  { %v39_v20 = vmul.f32 %v32_v12, %v11_v2  ;;  %v40_v21 = vmul.f32 %v36_v13, %v12_v5  ;;  %v41_v22 = vmul.f32 %v32_v12, %v13_v7  ;;  %v42_v23 = vmul.f32 %v36_v13, %v14_v8 }
   0x9   :  { %v43_v27 = vmul.f32 %v32_v12, %v15_v9  ;;  %v44_v28 = vmul.f32 %v36_v13, %v16_v10  ;;  %v45_v29 = vmul.f32 %v32_v12, %v17_v11  ;;  %v46_v30 = vmul.f32 %v36_v13, %v18_v14 }
   0xa   :  { %55 = vst [vmem:[%s191_s2] sm:$0xff] %v39_v20  ;;  %56 = vst [vmem:[%s191_s2 + $0x8] sm:$0xff] %v40_v21  ;;  %v47_v31 = vmul.f32 %v32_v12, %v19_v15  ;;  %v48_v32 = vmul.f32 %v36_v13, %v20_v16  ;;  %v49_v33 = vmul.f32 %v32_v12, %v21_v17 }
   0xb   :  { %57 = vst [vmem:[%s191_s2 + $0x10] sm:$0xff] %v41_v22  ;;  %58 = vst [vmem:[%s191_s2 + $0x18] sm:$0xff] %v42_v23  ;;  %v50_v34 = vmul.f32 %v36_v13, %v22_v18  ;;  %v51_v35 = vmul.f32 %v32_v12, %v23_v19  ;;  %v52_v36 = vmul.f32 %v36_v13, %v24_v24 }
   0xc   :  { %59 = vst [vmem:[%s191_s2 + $0x20] sm:$0xff] %v43_v27  ;;  %60 = vst [vmem:[%s191_s2 + $0x28] sm:$0xff] %v44_v28  ;;  %v53_v37 = vmul.f32 %v32_v12, %v25_v25  ;;  %v54_v38 = vmul.f32 %v36_v13, %v26_v26 }
   0xd   :  { %61 = vst [vmem:[%s191_s2 + $0x30] sm:$0xff] %v45_v29  ;;  %62 = vst [vmem:[%s191_s2 + $0x38] sm:$0xff] %v46_v30 }
   0xe   :  { %63 = vst [vmem:[%s191_s2 + $0x40] sm:$0xff] %v47_v31  ;;  %64 = vst [vmem:[%s191_s2 + $0x48] sm:$0xff] %v48_v32 }
   0xf   :  { %65 = vst [vmem:[%s191_s2 + $0x50] sm:$0xff] %v49_v33  ;;  %66 = vst [vmem:[%s191_s2 + $0x58] sm:$0xff] %v50_v34 }
  0x10   :  { %67 = vst [vmem:[%s191_s2 + $0x60] sm:$0xff] %v51_v35  ;;  %68 = vst [vmem:[%s191_s2 + $0x68] sm:$0xff] %v52_v36 }
  0x11   :  { %69 = vst [vmem:[%s191_s2 + $0x70] sm:$0xff] %v53_v37  ;;  %70 = vst [vmem:[%s191_s2 + $0x78] sm:$0xff] %v54_v38 }

</bundles_post_ra>
